<compile_context>
chip_gen: v7x
topology: tpu7x:2x2x1
jax: 0.10.0
libtpu: 0.0.40
codegen_flags: <defaults>
</compile_context>

<pallas_src>
import functools

import jax
import jax.numpy as jnp
from jax.experimental import pallas as pl
from jax.experimental.pallas import tpu as pltpu


# Lane-padded widths of the fused (actor | critic | pad) layers.
_XP = 128            # padded input width  : s_dim real lanes + one constant-1 lane
_L1 = 512            # layer 1: [a1(200) | c1(200) | pad | const@511]
_L2 = 256            # layer 2: [a2(100) | c2(100) | pad | const@255]
_L3 = 128            # layer 3: [a3(50)  | c3(50)  | pad | const@127]
_L4 = 128            # layer 4: [a4(a_dim) | v(1)  | pad(zeros)]


def net_kernel(x_ref, wa_ref, wb_ref, out_ref, *, a_dim):
    """Fused actor+critic MLP: 5 MXU matmuls, f32 accumulation, exact softmax."""
    x = x_ref[...]                                                  # (B, 128) bf16

    # ---- Layer 1: (B,128) @ (128,512).  Bias folded into row `s_dim` of W1.
    y1 = jnp.dot(x, wa_ref[0:_XP, :], preferred_element_type=jnp.float32)
    h1 = jnp.maximum(y1, 0.0).astype(jnp.bfloat16)                  # (B, 512)

    # ---- Layer 2: W2 (512,256) is split-packed as two (256,256) halves stored
    #      side by side in wa rows [128:384]; two MXU passes, same FLOPs.
    y2 = jnp.dot(h1[:, 0:_L2], wa_ref[_XP:_XP + _L1 // 2, 0:_L2],
                 preferred_element_type=jnp.float32)
    y2 = y2 + jnp.dot(h1[:, _L2:_L1], wa_ref[_XP:_XP + _L1 // 2, _L2:2 * _L2],
                      preferred_element_type=jnp.float32)
    h2 = jnp.maximum(y2, 0.0).astype(jnp.bfloat16)                  # (B, 256)

    # ---- Layer 3: (B,256) @ (256,128)
    y3 = jnp.dot(h2, wb_ref[0:_L2, :], preferred_element_type=jnp.float32)
    h3 = jnp.maximum(y3, 0.0).astype(jnp.bfloat16)                  # (B, 128)

    # ---- Layer 4: (B,128) @ (128,128) -> [relu actor logits | relu value | 0]
    h4 = jnp.maximum(
        jnp.dot(h3, wb_ref[_L2:_L2 + _L3, :], preferred_element_type=jnp.float32),
        0.0)                                                        # (B, 128) f32

    # ---- F.softmax(a4, dim=0): per-column softmax over the batch axis.
    # Column-independent, so applying it to the whole padded slab keeps the
    # actor columns [0:a_dim] exact; other lanes are overwritten below.
    m = jnp.max(h4, axis=0, keepdims=True)
    e = jnp.exp(h4 - m)
    denom = jnp.sum(e, axis=0, keepdims=True)
    probs = e * (1.0 / denom)          # exact normalization (probs sum to 1)

    col = jax.lax.broadcasted_iota(jnp.int32, h4.shape, 1)
    # Lanes [0:a_dim] = softmax(actor logits, dim=0); lane a_dim = relu value;
    # remaining lanes are zeros.  Single lane-dense (B, 128) store.
    out_ref[...] = jnp.where(col < a_dim, probs, h4)


def init_params(key, s_dim, a_dim):
    """set_init-style init: weights ~ N(0, 0.1) in (in, out) layout, biases = 0."""
    dims_a = [(s_dim, 200), (200, 100), (100, 50), (50, a_dim)]
    dims_c = [(s_dim, 200), (200, 100), (100, 50), (50, 1)]
    params = {}
    keys = jax.random.split(key, 8)
    for i, (din, dout) in enumerate(dims_a):
        params[f"aw{i+1}"] = 0.1 * jax.random.normal(keys[i], (din, dout), jnp.float32)
        params[f"ab{i+1}"] = jnp.zeros((1, dout), jnp.float32)
    for i, (din, dout) in enumerate(dims_c):
        params[f"cw{i+1}"] = 0.1 * jax.random.normal(keys[4 + i], (din, dout), jnp.float32)
        params[f"cb{i+1}"] = jnp.zeros((1, dout), jnp.float32)
    return params


def pack_params(p, s_dim, a_dim):
    """Pack actor/critic weights + biases into TWO contiguous bf16 slabs.

    Bias handling: the padded input carries a constant 1.0 in lane `s_dim`;
    each W_i has a bias row driven by the incoming constant lane and a single
    1.0 entry that regenerates the constant in the last padded lane of its
    output, so `relu(h @ W)` reproduces `relu(h @ W_real + b)` exactly.
    Done ONCE outside the kernel.
    """
    assert s_dim + 1 <= _XP, "s_dim too large for the 128-lane padded input"
    assert a_dim + 1 <= _L4, "a_dim too large for the packed 128-lane output slab"

    # ---- W1 : (128, 512)
    w1 = jnp.zeros((_XP, _L1), jnp.float32)
    w1 = w1.at[:s_dim, 0:200].set(p["aw1"]).at[:s_dim, 200:400].set(p["cw1"])
    w1 = w1.at[s_dim, 0:200].set(p["ab1"][0]).at[s_dim, 200:400].set(p["cb1"][0])
    w1 = w1.at[s_dim, _L1 - 1].set(1.0)          # propagate constant -> h1 lane 511

    # ---- W2 : (512, 256)
    w2 = jnp.zeros((_L1, _L2), jnp.float32)
    w2 = w2.at[0:200, 0:100].set(p["aw2"]).at[200:400, 100:200].set(p["cw2"])
    w2 = w2.at[_L1 - 1, 0:100].set(p["ab2"][0]).at[_L1 - 1, 100:200].set(p["cb2"][0])
    w2 = w2.at[_L1 - 1, _L2 - 1].set(1.0)        # constant -> h2 lane 255

    # ---- W3 : (256, 128)
    w3 = jnp.zeros((_L2, _L3), jnp.float32)
    w3 = w3.at[0:100, 0:50].set(p["aw3"]).at[100:200, 50:100].set(p["cw3"])
    w3 = w3.at[_L2 - 1, 0:50].set(p["ab3"][0]).at[_L2 - 1, 50:100].set(p["cb3"][0])
    w3 = w3.at[_L2 - 1, _L3 - 1].set(1.0)        # constant -> h3 lane 127

    # ---- W4 : (128, 128)   (no constant carrier needed after the last layer)
    w4 = jnp.zeros((_L3, _L4), jnp.float32)
    w4 = w4.at[0:50, 0:a_dim].set(p["aw4"]).at[50:100, a_dim:a_dim + 1].set(p["cw4"])
    w4 = w4.at[_L3 - 1, 0:a_dim].set(p["ab4"][0])
    w4 = w4.at[_L3 - 1, a_dim:a_dim + 1].set(p["cb4"][0])

    # ---- Coalesce into two contiguous slabs (exactly the raw bytes, no waste).
    # wa rows [0:128]  = W1
    # wa rows [128:384]= [ W2[0:256,:] | W2[256:512,:] ]   (split-packed, 512 lanes)
    wa = jnp.zeros((_XP + _L1 // 2, _L1), jnp.float32)               # (384, 512)
    wa = wa.at[0:_XP, :].set(w1)
    wa = wa.at[_XP:, 0:_L2].set(w2[0:_L1 // 2, :])
    wa = wa.at[_XP:, _L2:2 * _L2].set(w2[_L1 // 2:, :])
    # wb rows [0:256] = W3 ; rows [256:384] = W4
    wb = jnp.concatenate([w3, w4], axis=0)                           # (384, 128)

    return {"wa": wa.astype(jnp.bfloat16), "wb": wb.astype(jnp.bfloat16)}


@functools.partial(jax.jit, static_argnames=("a_dim",))
def net_forward(x, packed, a_dim):
    """x: (B, s_dim) f32.  Returns (a_probs (B, a_dim), v (B, 1))."""
    B, s_dim = x.shape
    # Lane-dense bf16 input slab with the constant-1 bias lane (built once here).
    xp = jnp.zeros((B, _XP), jnp.bfloat16)
    xp = xp.at[:, :s_dim].set(x.astype(jnp.bfloat16))
    xp = xp.at[:, s_dim].set(1.0)

    kernel = functools.partial(net_kernel, a_dim=a_dim)
    out = pl.pallas_call(
        kernel,
        out_shape=jax.ShapeDtypeStruct((B, _L4), jnp.float32),
        # Tiny problem (~0.5 MB weights): gridless, whole arrays VMEM-resident.
        # No batch grid on purpose — softmax(dim=0) couples every batch row, so
        # amortization comes from batching many states per call, with weights
        # DMA'd once per call and reused across the whole resident batch.
        in_specs=[pl.BlockSpec(memory_space=pltpu.MemorySpace.VMEM)] * 3,
        out_specs=pl.BlockSpec(memory_space=pltpu.MemorySpace.VMEM),
    )(xp, packed["wa"], packed["wb"])

    a_probs = out[:, 0:a_dim]
    v = out[:, a_dim:a_dim + 1]
    return a_probs, v


def reference_forward(x, p):
    """Pure-JAX f32 reference mirroring the PyTorch forward."""
    relu = lambda t: jnp.maximum(t, 0.0)
    a1 = relu(x @ p["aw1"] + p["ab1"])
    a2 = relu(a1 @ p["aw2"] + p["ab2"])
    a3 = relu(a2 @ p["aw3"] + p["ab3"])
    a4 = relu(a3 @ p["aw4"] + p["ab4"])
    a_probs = jax.nn.softmax(a4, axis=0)
    c1 = relu(x @ p["cw1"] + p["cb1"])
    c2 = relu(c1 @ p["cw2"] + p["cb2"])
    c3 = relu(c2 @ p["cw3"] + p["cb3"])
    v = relu(c3 @ p["cw4"] + p["cb4"])
    return a_probs, v


if __name__ == "__main__":
    s_dim, a_dim, B = 16, 4, 2
    key = jax.random.PRNGKey(0)
    k_params, k_x = jax.random.split(key)
    raw_params = init_params(k_params, s_dim, a_dim)
    packed = pack_params(raw_params, s_dim, a_dim)
    x = jax.random.normal(k_x, (B, s_dim), jnp.float32)

    a_probs, v = net_forward(x, packed, a_dim)
    jax.block_until_ready((a_probs, v))

    a_ref, v_ref = reference_forward(x, raw_params)
    assert a_probs.shape == (B, a_dim) and v.shape == (B, 1)
    # Exact normalization: softmax over dim=0 must sum to 1 per action column.
    assert jnp.allclose(jnp.sum(a_probs, axis=0), 1.0, atol=1e-4)
    # bf16 MXU operands vs. the f32 reference -> loose tolerance.
    assert jnp.allclose(a_probs, a_ref, atol=2e-2, rtol=5e-2)
    assert jnp.allclose(v, v_ref, atol=2e-2, rtol=5e-2)

    print("KERNEL_OK")
</pallas_src>

<mosaic_0001>
module attributes {stable_mosaic.version = 11 : i64} {
  func.func @net_kernel(%arg0: memref<2x128xbf16, #tpu.memory_space<vmem>>, %arg1: memref<384x512xbf16, #tpu.memory_space<vmem>>, %arg2: memref<384x128xbf16, #tpu.memory_space<vmem>>, %arg3: memref<2x128xf32, #tpu.memory_space<vmem>>) attributes {dimension_semantics = [], scalar_prefetch = 0 : i64, scratch_operands = 0 : i64, tpu.core_type = #tpu.core_type<tc>} {
    %c0 = arith.constant 0 : index
    %c0_0 = arith.constant 0 : index
    %0 = vector.load %arg0[%c0, %c0_0] : memref<2x128xbf16, #tpu.memory_space<vmem>>, vector<2x128xbf16>
    %c0_1 = arith.constant 0 : index
    %c0_2 = arith.constant 0 : index
    %1 = vector.load %arg1[%c0_1, %c0_2] : memref<384x512xbf16, #tpu.memory_space<vmem>>, vector<128x512xbf16>
    %cst = arith.constant dense<0.000000e+00> : vector<2x512xf32>
    %2 = tpu.matmul %0, %1, %cst {dimension_numbers = #tpu.dot_dimension_numbers<[1], [0], [0], [1], [0, 0, 1, 1], [], []>} : vector<2x128xbf16>, vector<128x512xbf16>, vector<2x512xf32> -> vector<2x512xf32>
    %cst_3 = arith.constant 0.000000e+00 : f32
    %3 = vector.broadcast %cst_3 : f32 to vector<2x512xf32>
    %4 = arith.maximumf %2, %3 : vector<2x512xf32>
    %5 = arith.truncf %4 : vector<2x512xf32> to vector<2x512xbf16>
    %6 = vector.extract_strided_slice %5 {offsets = [0, 0], sizes = [2, 256], strides = [1, 1]} : vector<2x512xbf16> to vector<2x256xbf16>
    %c128 = arith.constant 128 : index
    %c0_4 = arith.constant 0 : index
    %7 = vector.load %arg1[%c128, %c0_4] : memref<384x512xbf16, #tpu.memory_space<vmem>>, vector<256x256xbf16>
    %cst_5 = arith.constant dense<0.000000e+00> : vector<2x256xf32>
    %8 = tpu.matmul %6, %7, %cst_5 {dimension_numbers = #tpu.dot_dimension_numbers<[1], [0], [0], [1], [0, 0, 1, 1], [], []>} : vector<2x256xbf16>, vector<256x256xbf16>, vector<2x256xf32> -> vector<2x256xf32>
    %9 = vector.extract_strided_slice %5 {offsets = [0, 256], sizes = [2, 256], strides = [1, 1]} : vector<2x512xbf16> to vector<2x256xbf16>
    %c128_6 = arith.constant 128 : index
    %c256 = arith.constant 256 : index
    %10 = vector.load %arg1[%c128_6, %c256] : memref<384x512xbf16, #tpu.memory_space<vmem>>, vector<256x256xbf16>
    %cst_7 = arith.constant dense<0.000000e+00> : vector<2x256xf32>
    %11 = tpu.matmul %9, %10, %cst_7 {dimension_numbers = #tpu.dot_dimension_numbers<[1], [0], [0], [1], [0, 0, 1, 1], [], []>} : vector<2x256xbf16>, vector<256x256xbf16>, vector<2x256xf32> -> vector<2x256xf32>
    %12 = arith.addf %8, %11 : vector<2x256xf32>
    %cst_8 = arith.constant 0.000000e+00 : f32
    %13 = vector.broadcast %cst_8 : f32 to vector<2x256xf32>
    %14 = arith.maximumf %12, %13 : vector<2x256xf32>
    %15 = arith.truncf %14 : vector<2x256xf32> to vector<2x256xbf16>
    %c0_9 = arith.constant 0 : index
    %c0_10 = arith.constant 0 : index
    %16 = vector.load %arg2[%c0_9, %c0_10] : memref<384x128xbf16, #tpu.memory_space<vmem>>, vector<256x128xbf16>
    %cst_11 = arith.constant dense<0.000000e+00> : vector<2x128xf32>
    %17 = tpu.matmul %15, %16, %cst_11 {dimension_numbers = #tpu.dot_dimension_numbers<[1], [0], [0], [1], [0, 0, 1, 1], [], []>} : vector<2x256xbf16>, vector<256x128xbf16>, vector<2x128xf32> -> vector<2x128xf32>
    %cst_12 = arith.constant 0.000000e+00 : f32
    %18 = vector.broadcast %cst_12 : f32 to vector<2x128xf32>
    %19 = arith.maximumf %17, %18 : vector<2x128xf32>
    %20 = arith.truncf %19 : vector<2x128xf32> to vector<2x128xbf16>
    %c256_13 = arith.constant 256 : index
    %c0_14 = arith.constant 0 : index
    %21 = vector.load %arg2[%c256_13, %c0_14] : memref<384x128xbf16, #tpu.memory_space<vmem>>, vector<128x128xbf16>
    %cst_15 = arith.constant dense<0.000000e+00> : vector<2x128xf32>
    %22 = tpu.matmul %20, %21, %cst_15 {dimension_numbers = #tpu.dot_dimension_numbers<[1], [0], [0], [1], [0, 0, 1, 1], [], []>} : vector<2x128xbf16>, vector<128x128xbf16>, vector<2x128xf32> -> vector<2x128xf32>
    %cst_16 = arith.constant 0.000000e+00 : f32
    %23 = vector.broadcast %cst_16 : f32 to vector<2x128xf32>
    %24 = arith.maximumf %22, %23 : vector<2x128xf32>
    %cst_17 = arith.constant dense<0xFF800000> : vector<128xf32>
    %25 = vector.multi_reduction <maximumf>, %24, %cst_17 [0] : vector<2x128xf32> to vector<128xf32>
    %26 = vector.shape_cast %25 : vector<128xf32> to vector<1x128xf32>
    %27 = vector.broadcast %26 : vector<1x128xf32> to vector<2x128xf32>
    %28 = arith.subf %24, %27 : vector<2x128xf32>
    %29 = math.exp %28 : vector<2x128xf32>
    %cst_18 = arith.constant dense<0.000000e+00> : vector<128xf32>
    %30 = vector.multi_reduction <add>, %29, %cst_18 [0] : vector<2x128xf32> to vector<128xf32>
    %31 = vector.shape_cast %30 : vector<128xf32> to vector<1x128xf32>
    %cst_19 = arith.constant 1.000000e+00 : f32
    %32 = vector.broadcast %cst_19 : f32 to vector<1x128xf32>
    %33 = arith.divf %32, %31 : vector<1x128xf32>
    %34 = vector.broadcast %33 : vector<1x128xf32> to vector<2x128xf32>
    %35 = arith.mulf %29, %34 : vector<2x128xf32>
    %36 = tpu.iota {dimensions = array<i32: 1>} : vector<2x128xi32>
    %c4_i32 = arith.constant 4 : i32
    %37 = vector.broadcast %c4_i32 : i32 to vector<2x128xi32>
    %38 = arith.cmpi slt, %36, %37 : vector<2x128xi32>
    %39 = arith.select %38, %35, %24 : vector<2x128xi1>, vector<2x128xf32>
    %c0_20 = arith.constant 0 : index
    %c0_21 = arith.constant 0 : index
    %40 = vector.load %arg3[%c0_20, %c0_21] : memref<2x128xf32, #tpu.memory_space<vmem>>, vector<2x128xf32>
    tpu.vector_store %arg3[%c0_20, %c0_21], %39 {strides = array<i32>} : memref<2x128xf32, #tpu.memory_space<vmem>>, vector<2x128xf32>,
    return
  }
}

</mosaic_0001>

<bundles_post_ra>
// kernel: net_forward.1
= control target key start
LH: loop header
LB: loop body
LE: loop exit
PB: predicated region body
PF: predicated region fallthrough
CT: control target
= control target key end

     0   :  { %8 = vsyncpa [#allocation3], 0  ;;  %s1571_s0 = inlined_call_operand.vmem [shape: bf16[2,128], index: 0, kind: input, shape index: {}]   ;;  %s1572_s1 = inlined_call_operand.hbm [shape: bf16[384,512], index: 1, kind: input, shape index: {}]   ;;  %s1573_s2 = inlined_call_operand.hbm [shape: bf16[384,128], index: 2, kind: input, shape index: {}]   ;;  %s1574_s3 = inlined_call_operand.vmem [shape: f32[2,128], index: 3, kind: output, shape index: {}]  }
   0x1   :  { %9 = vsyncpa [#allocation5], 0  ;;  %s1507_s12 = smov [#allocation2]   ;;  %s1459_s16 = scalar_lea.hbm %s1572_s1, 12288 }
   0x2   :  { %s17_s13 = sshll.u32 %s1507_s12, 4  ;;  %p1460_p0 = scmp.ne.s32.totalorder %s1572_s1, %s1459_s16  ;;  %s18_s13 = int_to_ptr.vmem [resolvable:$true] %s17_s13 }
   0x3   :  { %p1463_p1 = scmp.lt.u32.totalorder %s1459_s16, %s1572_s1 }
   0x5   :  { %p1465_p2 = pnand %p1463_p1, %p1460_p0 }
   0x7   :  { %1468 = shalt.err (!%p1465_p2)
}
   0x8   :  { %s1469_s21 = scalar_lea.vmem %s18_s13, 12288  ;;  %p1474_p4 = scmp.lt.s32.totalorder %s18_s13, %s18_s13 }
   0x9   :  { %p1470_p3 = scmp.ne.s32.totalorder %s18_s13, %s1469_s21  ;;  %p1475_p5 = scmp.lt.s32.totalorder %s1469_s21, %s1469_s21 }
   0xb   :  { %p1476_p6 = por %p1475_p5, %p1474_p4 }
   0xd   :  { %p1477_p7 = pnand %p1476_p6, %p1470_p3 }
   0xf   :  { %1480 = shalt.err (!%p1477_p7)
}
  0x10   :  { %s1508_s22 = smov 256   ;;  %s1509_s23 = smov 16  }
  0x11   :  { %23 = dma.hbm_to_vmem [thread:$0]  %s1572_s1, 12288, %s18_s13, [#allocation3], %s1508_s22, %s1508_s22, %s1509_s23  }
  0x12   :  { %s1510_s26 = smov [#allocation4]   ;;  %s1481_s30 = scalar_lea.hbm %s1573_s2, 3072 }
  0x13   :  { %s29_s27 = sshll.u32 %s1510_s26, 4  ;;  %p1482_p8 = scmp.ne.s32.totalorder %s1573_s2, %s1481_s30  ;;  %s30_s27 = int_to_ptr.vmem [resolvable:$true] %s29_s27 }
  0x14   :  { %p1485_p9 = scmp.lt.u32.totalorder %s1481_s30, %s1573_s2 }
  0x16   :  { %p1487_p10 = pnand %p1485_p9, %p1482_p8 }
  0x18   :  { %1490 = shalt.err (!%p1487_p10)
}
  0x19   :  { %s1491_s8 = scalar_lea.vmem %s30_s27, 3072  ;;  %p1496_p12 = scmp.lt.s32.totalorder %s30_s27, %s30_s27 }
  0x1a   :  { %p1492_p11 = scmp.ne.s32.totalorder %s30_s27, %s1491_s8  ;;  %p1497_p13 = scmp.lt.s32.totalorder %s1491_s8, %s1491_s8 }
  0x1c   :  { %p1498_p0 = por %p1497_p13, %p1496_p12 }
  0x1e   :  { %p1499_p1 = pnand %p1498_p0, %p1492_p11 }
  0x20   :  { %1502 = shalt.err (!%p1499_p1)
}
  0x21   :  { %s1511_s1 = smov 64   ;;  %s1512_s9 = smov 4  }
  0x22   :  { %35 = dma.hbm_to_vmem [thread:$0]  %s1573_s2, 3072, %s30_s27, [#allocation5], %s1511_s1, %s1511_s1, %s1512_s9  }
  0x23   :  { %1503 = dma.done.wait [#allocation3], 12288  }
  0x24   :  { %1504 = vsyncadd [#allocation3], 4294955008 }
  0x25   :  { %1505 = dma.done.wait [#allocation5], 3072  }
  0x26   :  { %1506 = vsyncadd [#allocation5], 4294964224  ;;  %v1513_v0 = vmov 0   ;;  %v1287_v1 = vld [vmem:[#allocation2 + $0x4] ss:$16 sps:$4 sm:$0xff]   ;;  %vm1515_vm0 = vmmov 0  }
  0x27   :  { %268 = vmatprep.mubr.bf16.mxu1 %v1513_v0  ;;  %v1289_v2 = vld [vmem:[#allocation2] ss:$16 sps:$4 sm:$0xff]   ;;  %236 = vmatprep.subr.bf16.mxu1 %v1287_v1  ;;  %v1290_v3 = vld [vmem:[#allocation2 + $0x24] ss:$16 sps:$4 sm:$0xff]   ;;  %v1335_v15 = vld [vmem:[#allocation2 + $0x10c] ss:$16 sps:$4 sm:$0xff]  }
  0x28   :  { %237 = vmatpush1.bf16.msra.mxu1 %v1289_v2  ;;  %v1292_v4 = vld [vmem:[#allocation2 + $0x20] ss:$16 sps:$4 sm:$0xff]   ;;  %v1293_v5 = vld [vmem:[#allocation2 + $0x44] ss:$16 sps:$4 sm:$0xff]   ;;  %v1337_v16 = vld [vmem:[#allocation2 + $0x108] ss:$16 sps:$4 sm:$0xff]   ;;  %550 = vmatprep.subr.bf16.mxu0 %v1335_v15 }
  0x29   :  { %238 = vmatprep.subr.bf16.mxu1 %v1290_v3  ;;  %v1295_v6 = vld [vmem:[#allocation2 + $0x40] ss:$16 sps:$4 sm:$0xff]   ;;  %v1296_v7 = vld [vmem:[#allocation2 + $0x64] ss:$16 sps:$4 sm:$0xff]   ;;  %v1338_v17 = vld [vmem:[#allocation2 + $0x12c] ss:$16 sps:$4 sm:$0xff]   ;;  %551 = vmatpush1.bf16.msra.mxu0 %v1337_v16 }
  0x2a   :  { %v1298_v8 = vld [vmem:[#allocation2 + $0x60] ss:$16 sps:$4 sm:$0xff]   ;;  %v1299_v9 = vld [vmem:[#allocation2 + $0x84] ss:$16 sps:$4 sm:$0xff]   ;;  %v1340_v19 = vld [vmem:[#allocation2 + $0x128] ss:$16 sps:$4 sm:$0xff]   ;;  %552 = vmatprep.subr.bf16.mxu0 %v1338_v17 }
  0x2b   :  { %v1301_v10 = vld [vmem:[#allocation2 + $0x80] ss:$16 sps:$4 sm:$0xff]   ;;  %v1302_v11 = vld [vmem:[#allocation2 + $0xa4] ss:$16 sps:$4 sm:$0xff]   ;;  %v1341_v20 = vld [vmem:[#allocation2 + $0x14c] ss:$16 sps:$4 sm:$0xff]  }
  0x2c   :  { %239 = vmatpush1.bf16.msra.mxu1 %v1292_v4  ;;  %v1304_v12 = vld [vmem:[#allocation2 + $0xa0] ss:$16 sps:$4 sm:$0xff]   ;;  %v1305_v13 = vld [vmem:[#allocation2 + $0xc4] ss:$16 sps:$4 sm:$0xff]   ;;  %v1313_v22 = vld [vmem:[#allocation2 + $0xc] ss:$16 sps:$4 sm:$0xff]  }
  0x2d   :  { %240 = vmatprep.subr.bf16.mxu1 %v1293_v5  ;;  %v1307_v14 = vld [vmem:[#allocation2 + $0xc0] ss:$16 sps:$4 sm:$0xff]   ;;  %v1308_v18 = vld [vmem:[#allocation2 + $0xe4] ss:$16 sps:$4 sm:$0xff]   ;;  %v1311_v24 = vld [vmem:[#allocation2 + $0x8] ss:$16 sps:$4 sm:$0xff]   ;;  %553 = vmatpush1.bf16.msra.mxu0 %v1340_v19 }
  0x2e   :  { %v1310_v21 = vld [vmem:[#allocation2 + $0xe0] ss:$16 sps:$4 sm:$0xff]   ;;  %v1343_v25 = vld [vmem:[#allocation2 + $0x148] ss:$16 sps:$4 sm:$0xff]   ;;  %v1316_v26 = vld [vmem:[#allocation2 + $0x2c] ss:$16 sps:$4 sm:$0xff]   ;;  %554 = vmatprep.subr.bf16.mxu0 %v1341_v20 }
  0x2f   :  { %v43_v23 = vld [vmem:[%s1571_s0] sm:$0x1]  ;;  %v1344_v27 = vld [vmem:[#allocation2 + $0x16c] ss:$16 sps:$4 sm:$0xff]   ;;  %v1346_v28 = vld [vmem:[#allocation2 + $0x168] ss:$16 sps:$4 sm:$0xff]  }
  0x30   :  { %241 = vmatpush1.bf16.msra.mxu1 %v1295_v6  ;;  %v1347_v29 = vld [vmem:[#allocation2 + $0x18c] ss:$16 sps:$4 sm:$0xff]   ;;  %v1314_v30 = vld [vmem:[#allocation2 + $0x28] ss:$16 sps:$4 sm:$0xff]   ;;  %v1385_v2 = vld [vmem:[#allocation2 + $0x104] ss:$16 sps:$4 sm:$0xff]  }
  0x31   :  { %242 = vmatprep.subr.bf16.mxu1 %v1296_v7  ;;  %555 = vmatpush1.bf16.msra.mxu0 %v1343_v25  ;;  %v1319_v31 = vld [vmem:[#allocation2 + $0x4c] ss:$16 sps:$4 sm:$0xff]   ;;  %v1349_v32 = vld [vmem:[#allocation2 + $0x188] ss:$16 sps:$4 sm:$0xff]   ;;  %v1431_v3 = vld [vmem:[#allocation4 + $0x40] sm:$0xff]   ;;  %vm1071_vm1 = vcmask 1041408  }
  0x32   :  { %556 = vmatprep.subr.bf16.mxu0 %v1344_v27  ;;  %v1350_v33 = vld [vmem:[#allocation2 + $0x1ac] ss:$16 sps:$4 sm:$0xff]   ;;  %v1317_v34 = vld [vmem:[#allocation2 + $0x48] ss:$16 sps:$4 sm:$0xff]   ;;  %v1432_v4 = vld [vmem:[#allocation4] sm:$0xff]  }
  0x33   :  { %v1322_v35 = vld [vmem:[#allocation2 + $0x6c] ss:$16 sps:$4 sm:$0xff]   ;;  %v1352_v36 = vld [vmem:[#allocation2 + $0x1a8] ss:$16 sps:$4 sm:$0xff]   ;;  %v1435_v7 = vld [vmem:[#allocation4 + $0x50] sm:$0xff]  }
  0x34   :  { %243 = vmatpush1.bf16.msra.mxu1 %v1298_v8  ;;  %v1353_v37 = vld [vmem:[#allocation2 + $0x1cc] ss:$16 sps:$4 sm:$0xff]   ;;  %v1320_v38 = vld [vmem:[#allocation2 + $0x68] ss:$16 sps:$4 sm:$0xff]   ;;  %v1436_v8 = vld [vmem:[#allocation4 + $0x10] sm:$0xff]  }
  0x35   :  { %244 = vmatprep.subr.bf16.mxu1 %v1299_v9  ;;  %557 = vmatpush1.bf16.msra.mxu0 %v1346_v28  ;;  %v1325_v39 = vld [vmem:[#allocation2 + $0x8c] ss:$16 sps:$4 sm:$0xff]   ;;  %v1355_v40 = vld [vmem:[#allocation2 + $0x1c8] ss:$16 sps:$4 sm:$0xff]   ;;  %v1443_v15 = vld [vmem:[#allocation4 + $0x70] sm:$0xff]  }
  0x36   :  { %558 = vmatprep.subr.bf16.mxu0 %v1347_v29  ;;  %v1323_v41 = vld [vmem:[#allocation2 + $0x88] ss:$16 sps:$4 sm:$0xff]   ;;  %v1328_v42 = vld [vmem:[#allocation2 + $0xac] ss:$16 sps:$4 sm:$0xff]   ;;  %v1383_v28 = vld [vmem:[#allocation2 + $0x100] ss:$16 sps:$4 sm:$0xff]  }
  0x37   :  { %v1326_v43 = vld [vmem:[#allocation2 + $0xa8] ss:$16 sps:$4 sm:$0xff]   ;;  %v1331_v44 = vld [vmem:[#allocation2 + $0xcc] ss:$16 sps:$4 sm:$0xff]  }
  0x38   :  { %245 = vmatpush1.bf16.msra.mxu1 %v1301_v10  ;;  %v1329_v45 = vld [vmem:[#allocation2 + $0xc8] ss:$16 sps:$4 sm:$0xff]   ;;  %v1334_v46 = vld [vmem:[#allocation2 + $0xec] ss:$16 sps:$4 sm:$0xff]  }
  0x39   :  { %246 = vmatprep.subr.bf16.mxu1 %v1302_v11  ;;  %559 = vmatpush1.bf16.msra.mxu0 %v1349_v32  ;;  %v1332_v47 = vld [vmem:[#allocation2 + $0xe8] ss:$16 sps:$4 sm:$0xff]   ;;  %v1356_v48 = vld [vmem:[#allocation2 + $0x1ec] ss:$16 sps:$4 sm:$0xff]   ;;  %v1439_v11 = vld [vmem:[#allocation4 + $0x60] sm:$0xff]  }
  0x3a   :  { %560 = vmatprep.subr.bf16.mxu0 %v1350_v33  ;;  %v1358_v49 = vld [vmem:[#allocation2 + $0x1e8] ss:$16 sps:$4 sm:$0xff]   ;;  %v1359_v50 = vld [vmem:[#allocation2 + $0x20c] ss:$16 sps:$4 sm:$0xff]   ;;  %v1386_v32 = vld [vmem:[#allocation2 + $0x120] ss:$16 sps:$4 sm:$0xff]  }
  0x3b   :  { %v1361_v51 = vld [vmem:[#allocation2 + $0x208] ss:$16 sps:$4 sm:$0xff]   ;;  %v1362_v52 = vld [vmem:[#allocation2 + $0x22c] ss:$16 sps:$4 sm:$0xff]   ;;  %v1391_v33 = vld [vmem:[#allocation2 + $0x144] ss:$16 sps:$4 sm:$0xff]  }
  0x3c   :  { %247 = vmatpush1.bf16.msra.mxu1 %v1304_v12  ;;  %v1364_v53 = vld [vmem:[#allocation2 + $0x228] ss:$16 sps:$4 sm:$0xff]   ;;  %v1365_v54 = vld [vmem:[#allocation2 + $0x24c] ss:$16 sps:$4 sm:$0xff]   ;;  %v1440_v12 = vld [vmem:[#allocation4 + $0x20] sm:$0xff]  }
  0x3d   :  { %248 = vmatprep.subr.bf16.mxu1 %v1305_v13  ;;  %561 = vmatpush1.bf16.msra.mxu0 %v1352_v36  ;;  %v1367_v55 = vld [vmem:[#allocation2 + $0x248] ss:$16 sps:$4 sm:$0xff]   ;;  %v1368_v56 = vld [vmem:[#allocation2 + $0x26c] ss:$16 sps:$4 sm:$0xff]   ;;  %v1392_v36 = vld [vmem:[#allocation2 + $0x160] ss:$16 sps:$4 sm:$0xff]  }
  0x3e   :  { %562 = vmatprep.subr.bf16.mxu0 %v1353_v37  ;;  %v1370_v57 = vld [vmem:[#allocation2 + $0x268] ss:$16 sps:$4 sm:$0xff]   ;;  %v1371_v58 = vld [vmem:[#allocation2 + $0x28c] ss:$16 sps:$4 sm:$0xff]   ;;  %v1397_v37 = vld [vmem:[#allocation2 + $0x184] ss:$16 sps:$4 sm:$0xff]  }
  0x3f   :  { %v1373_v59 = vld [vmem:[#allocation2 + $0x288] ss:$16 sps:$4 sm:$0xff]   ;;  %v1374_v60 = vld [vmem:[#allocation2 + $0x2ac] ss:$16 sps:$4 sm:$0xff]  }
  0x40   :  { %249 = vmatpush1.bf16.msra.mxu1 %v1307_v14  ;;  %v1376_v61 = vld [vmem:[#allocation2 + $0x2a8] ss:$16 sps:$4 sm:$0xff]   ;;  %v1377_v62 = vld [vmem:[#allocation2 + $0x2cc] ss:$16 sps:$4 sm:$0xff]  }
  0x41   :  { %250 = vmatprep.subr.bf16.mxu1 %v1308_v18  ;;  %563 = vmatpush1.bf16.msra.mxu0 %v1355_v40  ;;  %v1379_v63 = vld [vmem:[#allocation2 + $0x2c8] ss:$16 sps:$4 sm:$0xff]   ;;  %v1398_v40 = vld [vmem:[#allocation2 + $0x1a0] ss:$16 sps:$4 sm:$0xff]  }
  0x42   :  { %564 = vmatprep.subr.bf16.mxu0 %v1356_v48  ;;  %v1382_v1 = vld [vmem:[#allocation2 + $0x2e8] ss:$16 sps:$4 sm:$0xff]   ;;  %v1410_v48 = vld [vmem:[#allocation2 + $0x220] ss:$16 sps:$4 sm:$0xff]  }
  0x43   :  { %v1433_v5 = vld [vmem:[#allocation4 + $0x48] sm:$0xff]   ;;  %v1437_v9 = vld [vmem:[#allocation4 + $0x58] sm:$0xff]  }
  0x44   :  { %251 = vmatpush1.bf16.msra.mxu1 %v1310_v21  ;;  %v1434_v6 = vld [vmem:[#allocation4 + $0x8] sm:$0xff]   ;;  %v1438_v10 = vld [vmem:[#allocation4 + $0x18] sm:$0xff]  }
  0x45   :  { %277 = vmatprep.subr.bf16.mxu1 %v1313_v22  ;;  %565 = vmatpush1.bf16.msra.mxu0 %v1358_v49  ;;  %v1441_v13 = vld [vmem:[#allocation4 + $0x68] sm:$0xff]   ;;  %v1415_v49 = vld [vmem:[#allocation2 + $0x244] ss:$16 sps:$4 sm:$0xff]  }
  0x46   :  { %566 = vmatprep.subr.bf16.mxu0 %v1359_v50  ;;  %v1442_v14 = vld [vmem:[#allocation4 + $0x28] sm:$0xff]   ;;  %v1413_v50 = vld [vmem:[#allocation2 + $0x240] ss:$16 sps:$4 sm:$0xff]  }
  0x47   :  { %269 = vmatmul.mubr.bf16.vlgmr.msra.gmra.mrb[0].mxu1 %v43_v23 }
  0x48   :  { %278 = vmatpush1.bf16.msra.mxu1 %v1311_v24  ;;  %309 = vmatprep.mubr.bf16.mxu1 %v1513_v0  ;;  %v1380_v0 = vld [vmem:[#allocation2 + $0x2ec] ss:$16 sps:$4 sm:$0xff]  }
  0x49   :  { %279 = vmatprep.subr.bf16.mxu1 %v1316_v26  ;;  %567 = vmatpush1.bf16.msra.mxu0 %v1361_v51  ;;  %v1418_v51 = vld [vmem:[#allocation2 + $0x264] ss:$16 sps:$4 sm:$0xff]  }
  0x4a   :  { %568 = vmatprep.subr.bf16.mxu0 %v1362_v52  ;;  %v1416_v52 = vld [vmem:[#allocation2 + $0x260] ss:$16 sps:$4 sm:$0xff]  }
  0x4c   :  { %280 = vmatpush1.bf16.msra.mxu1 %v1314_v30  ;;  %v1388_v30 = vld [vmem:[#allocation2 + $0x124] ss:$16 sps:$4 sm:$0xff]  }
  0x4d   :  { %281 = vmatprep.subr.bf16.mxu1 %v1319_v31  ;;  %569 = vmatpush1.bf16.msra.mxu0 %v1364_v53  ;;  %v1421_v53 = vld [vmem:[#allocation2 + $0x284] ss:$16 sps:$4 sm:$0xff]  }
  0x4e   :  { %570 = vmatprep.subr.bf16.mxu0 %v1365_v54  ;;  %v1419_v54 = vld [vmem:[#allocation2 + $0x280] ss:$16 sps:$4 sm:$0xff]  }
  0x50   :  { %282 = vmatpush1.bf16.msra.mxu1 %v1317_v34  ;;  %v1389_v34 = vld [vmem:[#allocation2 + $0x140] ss:$16 sps:$4 sm:$0xff]  }
  0x51   :  { %283 = vmatprep.subr.bf16.mxu1 %v1322_v35  ;;  %571 = vmatpush1.bf16.msra.mxu0 %v1367_v55  ;;  %v1394_v35 = vld [vmem:[#allocation2 + $0x164] ss:$16 sps:$4 sm:$0xff]  }
  0x52   :  { %572 = vmatprep.subr.bf16.mxu0 %v1368_v56  ;;  %v1424_v55 = vld [vmem:[#allocation2 + $0x2a4] ss:$16 sps:$4 sm:$0xff]   ;;  %v1422_v56 = vld [vmem:[#allocation2 + $0x2a0] ss:$16 sps:$4 sm:$0xff]  }
  0x54   :  { %284 = vmatpush1.bf16.msra.mxu1 %v1320_v38  ;;  %v1395_v38 = vld [vmem:[#allocation2 + $0x180] ss:$16 sps:$4 sm:$0xff]  }
  0x55   :  { %285 = vmatprep.subr.bf16.mxu1 %v1325_v39  ;;  %573 = vmatpush1.bf16.msra.mxu0 %v1370_v57  ;;  %v1400_v39 = vld [vmem:[#allocation2 + $0x1a4] ss:$16 sps:$4 sm:$0xff]  }
  0x56   :  { %574 = vmatprep.subr.bf16.mxu0 %v1371_v58  ;;  %v1427_v57 = vld [vmem:[#allocation2 + $0x2c4] ss:$16 sps:$4 sm:$0xff]   ;;  %v1425_v58 = vld [vmem:[#allocation2 + $0x2c0] ss:$16 sps:$4 sm:$0xff]  }
  0x58   :  { %286 = vmatpush1.bf16.msra.mxu1 %v1323_v41  ;;  %v1403_v41 = vld [vmem:[#allocation2 + $0x1c4] ss:$16 sps:$4 sm:$0xff]  }
  0x59   :  { %287 = vmatprep.subr.bf16.mxu1 %v1328_v42  ;;  %575 = vmatpush1.bf16.msra.mxu0 %v1373_v59  ;;  %v1401_v42 = vld [vmem:[#allocation2 + $0x1c0] ss:$16 sps:$4 sm:$0xff]   ;;  %v1430_v59 = vld [vmem:[#allocation2 + $0x2e4] ss:$16 sps:$4 sm:$0xff]  }
  0x5a   :  { %576 = vmatprep.subr.bf16.mxu0 %v1374_v60  ;;  %v1428_v60 = vld [vmem:[#allocation2 + $0x2e0] ss:$16 sps:$4 sm:$0xff]  }
  0x5c   :  { %288 = vmatpush1.bf16.msra.mxu1 %v1326_v43  ;;  %v1406_v43 = vld [vmem:[#allocation2 + $0x1e4] ss:$16 sps:$4 sm:$0xff]  }
  0x5d   :  { %289 = vmatprep.subr.bf16.mxu1 %v1331_v44  ;;  %577 = vmatpush1.bf16.msra.mxu0 %v1376_v61  ;;  %v1404_v44 = vld [vmem:[#allocation2 + $0x1e0] ss:$16 sps:$4 sm:$0xff]  }
  0x5e   :  { %578 = vmatprep.subr.bf16.mxu0 %v1377_v62 }
  0x60   :  { %290 = vmatpush1.bf16.msra.mxu1 %v1329_v45  ;;  %v1409_v45 = vld [vmem:[#allocation2 + $0x204] ss:$16 sps:$4 sm:$0xff]  }
  0x61   :  { %291 = vmatprep.subr.bf16.mxu1 %v1334_v46  ;;  %579 = vmatpush1.bf16.msra.mxu0 %v1379_v63  ;;  %v1407_v46 = vld [vmem:[#allocation2 + $0x200] ss:$16 sps:$4 sm:$0xff]  }
  0x62   :  { %580 = vmatprep.subr.bf16.mxu0 %v1380_v0  ;;  %v1444_v63 = vld [vmem:[#allocation4 + $0x30] sm:$0xff]   ;;  %v1445_v0 = vld [vmem:[#allocation4 + $0x78] sm:$0xff]  }
  0x64   :  { %292 = vmatpush1.bf16.msra.mxu1 %v1332_v47  ;;  %v1412_v47 = vld [vmem:[#allocation2 + $0x224] ss:$16 sps:$4 sm:$0xff]  }
  0x65   :  { %581 = vmatpush1.bf16.msra.mxu0 %v1382_v1  ;;  %1223 = vmatprep.subr.bf16.mxu1 %v1431_v3  ;;  %v1446_v1 = vld [vmem:[#allocation4 + $0x38] sm:$0xff]  }
  0x66   :  { %751 = vmatprep.subr.bf16.mxu0 %v1385_v2  ;;  %v1514_v2 = vmov 0.0  }
  0x67   :  { %310 = vmatmul.mubr.bf16.vlgmr.msra.gmra.mrb[4].mxu1 %v43_v23 }
  0x68   :  { %1224 = vmatpush3.bf16.msra.mxu1 %v1432_v4 }
  0x69   :  { %1225 = vmatprep.subr.bf16.mxu1 %v1433_v5 }
  0x6c   :  { %1226 = vmatpush3.bf16.msra.mxu1 %v1434_v6 }
  0x6d   :  { %1227 = vmatprep.subr.bf16.mxu1 %v1435_v7 }
  0x70   :  { %1228 = vmatpush3.bf16.msra.mxu1 %v1436_v8 }
  0x71   :  { %1229 = vmatprep.subr.bf16.mxu1 %v1437_v9 }
  0x74   :  { %1230 = vmatpush3.bf16.msra.mxu1 %v1438_v10  ;;  %v1447_v10 = vld [vmem:[#allocation4 + $0x80] sm:$0xff]  }
  0x75   :  { %1231 = vmatprep.subr.bf16.mxu1 %v1439_v11 }
  0x78   :  { %1232 = vmatpush3.bf16.msra.mxu1 %v1440_v12  ;;  %v1448_v12 = vld [vmem:[#allocation4 + $0x88] sm:$0xff]  }
  0x79   :  { %1233 = vmatprep.subr.bf16.mxu1 %v1441_v13  ;;  %v1449_v13 = vld [vmem:[#allocation4 + $0x90] sm:$0xff]  }
  0x7c   :  { %1234 = vmatpush3.bf16.msra.mxu1 %v1442_v14  ;;  %v1450_v14 = vld [vmem:[#allocation4 + $0x98] sm:$0xff]  }
  0x7d   :  { %1235 = vmatprep.subr.bf16.mxu1 %v1443_v15  ;;  %v1451_v15 = vld [vmem:[#allocation4 + $0xa0] sm:$0xff]  }
  0x80   :  { %1236 = vmatpush3.bf16.msra.mxu1 %v1444_v63 }
  0x81   :  { %1237 = vmatprep.subr.bf16.mxu1 %v1445_v0 }
  0x84   :  { %1238 = vmatpush3.bf16.msra.mxu1 %v1446_v1 }
  0x85   :  { %1254 = vmatprep.subr.bf16.mxu1 %v1514_v2 }
 0x11a   :  { %v1563_v16 = vpop.f32.mrb[0].mxu1 }
 0x11b   :  { %v272_v17 = vpop.f32.mrb[1].mxu1  ;;  %v318_v61 = vmax.f32 %v1563_v16, 0.0  ;;  %v1452_v16 = vld [vmem:[#allocation4 + $0xa8] sm:$0xff]  }
 0x11c   :  { %v274_v18 = vpop.f32.mrb[2].mxu1  ;;  %v319_v23 = vmax.f32 %v272_v17, 0.0  ;;  %v1453_v17 = vld [vmem:[#allocation4 + $0xb0] sm:$0xff]  }
 0x11d   :  { %v275_v19 = vpop.f32.mrb[3].mxu1  ;;  %v322_v62 = vpack.c.bf16 %v318_v61, %v318_v61  ;;  %v1454_v18 = vld [vmem:[#allocation4 + $0xb8] sm:$0xff]  }
 0x11e   :  { %v323_v31 = vpack.c.bf16 %v319_v23, %v319_v23 }
 0x13a   :  { %v311_v20 = vpop.f32.mrb[4].mxu1 }
 0x13b   :  { %v320_v21 = vmax.f32 %v311_v20, 0.0  ;;  %v313_v22 = vpop.f32.mrb[5].mxu1 }
 0x13c   :  { %v315_v24 = vpop.f32.mrb[6].mxu1  ;;  %v321_v25 = vmax.f32 %v313_v22, 0.0 }
 0x13d   :  { %v316_v26 = vpop.f32.mrb[7].mxu1  ;;  %v324_v29 = vpack.c.bf16 %v320_v21, %v320_v21 }
 0x13e   :  { %v325_v27 = vpack.c.bf16 %v321_v25, %v321_v25 }
 0x140   :  { %582 = vmatprep.mubr.bf16.mxu0 %v325_v27 }
 0x141   :  { %583 = vmatmul.mubr.bf16.vlgmr.msra.gmra.mrb[0].mxu0 %v324_v29 }
 0x142   :  { %752 = vmatpush1.bf16.msra.mxu0 %v1383_v28  ;;  %783 = vmatprep.mubr.bf16.mxu0 %v323_v31 }
 0x143   :  { %753 = vmatprep.subr.bf16.mxu0 %v1388_v30 }
 0x146   :  { %754 = vmatpush1.bf16.msra.mxu0 %v1386_v32 }
 0x147   :  { %755 = vmatprep.subr.bf16.mxu0 %v1391_v33 }
 0x14a   :  { %756 = vmatpush1.bf16.msra.mxu0 %v1389_v34 }
 0x14b   :  { %757 = vmatprep.subr.bf16.mxu0 %v1394_v35 }
 0x14e   :  { %758 = vmatpush1.bf16.msra.mxu0 %v1392_v36 }
 0x14f   :  { %759 = vmatprep.subr.bf16.mxu0 %v1397_v37 }
 0x152   :  { %760 = vmatpush1.bf16.msra.mxu0 %v1395_v38 }
 0x153   :  { %761 = vmatprep.subr.bf16.mxu0 %v1400_v39 }
 0x156   :  { %762 = vmatpush1.bf16.msra.mxu0 %v1398_v40 }
 0x157   :  { %763 = vmatprep.subr.bf16.mxu0 %v1403_v41 }
 0x15a   :  { %764 = vmatpush1.bf16.msra.mxu0 %v1401_v42 }
 0x15b   :  { %765 = vmatprep.subr.bf16.mxu0 %v1406_v43 }
 0x15e   :  { %766 = vmatpush1.bf16.msra.mxu0 %v1404_v44 }
 0x15f   :  { %767 = vmatprep.subr.bf16.mxu0 %v1409_v45 }
 0x162   :  { %768 = vmatpush1.bf16.msra.mxu0 %v1407_v46 }
 0x163   :  { %769 = vmatprep.subr.bf16.mxu0 %v1412_v47 }
 0x166   :  { %770 = vmatpush1.bf16.msra.mxu0 %v1410_v48  ;;  %v1092_v48 = vlaneseq }
 0x167   :  { %771 = vmatprep.subr.bf16.mxu0 %v1415_v49 }
 0x168   :  { %v1093_v49 = vand.u32 127, %v1092_v48 }
 0x16a   :  { %772 = vmatpush1.bf16.msra.mxu0 %v1413_v50  ;;  %vm1094_vm2 = vcmp.lt.s32.totalorder %v1093_v49, 4 }
 0x16b   :  { %773 = vmatprep.subr.bf16.mxu0 %v1418_v51 }
 0x16e   :  { %774 = vmatpush1.bf16.msra.mxu0 %v1416_v52 }
 0x16f   :  { %775 = vmatprep.subr.bf16.mxu0 %v1421_v53 }
 0x172   :  { %776 = vmatpush1.bf16.msra.mxu0 %v1419_v54 }
 0x173   :  { %777 = vmatprep.subr.bf16.mxu0 %v1424_v55 }
 0x176   :  { %778 = vmatpush1.bf16.msra.mxu0 %v1422_v56 }
 0x177   :  { %779 = vmatprep.subr.bf16.mxu0 %v1427_v57 }
 0x17a   :  { %780 = vmatpush1.bf16.msra.mxu0 %v1425_v58 }
 0x17b   :  { %781 = vmatprep.subr.bf16.mxu0 %v1430_v59 }
 0x17e   :  { %782 = vmatpush1.bf16.msra.mxu0 %v1428_v60 }
 0x181   :  { %784 = vmatmul.mubr.bf16.vlgmr.msra.gmra.mrb[0].mxu0 %v322_v62 }
 0x254   :  { %v785_v3 = vpop.f32.mrb[0].mxu0 }
 0x255   :  { %v792_v4 = vmax.f32 %v785_v3, 0.0  ;;  %v787_v5 = vpop.f32.mrb[1].mxu0 }
 0x256   :  { %v793_v6 = vmax.f32 %v787_v5, 0.0  ;;  %v789_v7 = vpop.f32.mrb[2].mxu0 }
 0x257   :  { %v790_v8 = vpop.f32.mrb[3].mxu0  ;;  %v794_v11 = vpack.c.bf16 %v792_v4, %v792_v4 }
 0x258   :  { %v795_v9 = vpack.c.bf16 %v793_v6, %v793_v6 }
 0x25a   :  { %956 = vmatprep.mubr.bf16.mxu1 %v795_v9 }
 0x25b   :  { %957 = vmatmul.mubr.bf16.vlgmr.msra.gmra.mrb[8].mxu1 %v794_v11 }
 0x25c   :  { %1255 = vmatpush3.bf16.msra.mxu1 %v1447_v10  ;;  %1270 = vmatprep.mubr.msk.bf16.mxu1 %vm1515_vm0, %v1514_v2 }
 0x25d   :  { %1256 = vmatprep.subr.bf16.mxu1 %v1514_v2 }
 0x260   :  { %1257 = vmatpush3.bf16.msra.mxu1 %v1448_v12 }
 0x261   :  { %1258 = vmatprep.subr.bf16.mxu1 %v1514_v2 }
 0x264   :  { %1259 = vmatpush3.bf16.msra.mxu1 %v1449_v13 }
 0x265   :  { %1260 = vmatprep.subr.bf16.mxu1 %v1514_v2 }
 0x268   :  { %1261 = vmatpush3.bf16.msra.mxu1 %v1450_v14 }
 0x269   :  { %1262 = vmatprep.subr.bf16.mxu1 %v1514_v2 }
 0x26c   :  { %1263 = vmatpush3.bf16.msra.mxu1 %v1451_v15 }
 0x26d   :  { %1264 = vmatprep.subr.bf16.mxu1 %v1514_v2 }
 0x270   :  { %1265 = vmatpush3.bf16.msra.mxu1 %v1452_v16 }
 0x271   :  { %1266 = vmatprep.subr.bf16.mxu1 %v1514_v2 }
 0x274   :  { %1267 = vmatpush3.bf16.msra.mxu1 %v1453_v17 }
 0x275   :  { %1268 = vmatprep.subr.bf16.mxu1 %v1514_v2 }
 0x278   :  { %1269 = vmatpush3.bf16.msra.mxu1 %v1454_v18 }
 0x32e   :  { %v1239_v19 = vpop.f32.mrb[8].mxu1 }
 0x32f   :  { %v1240_v20 = vpop.f32.mrb[9].mxu1 }
 0x330   :  { %v1241_v21 = vadd.f32 %v1240_v20, %v1239_v19  ;;  %v1242_v22 = vpop.f32.mrb[10].mxu1 }
 0x331   :  { %v1243_v23 = vpop.f32.mrb[11].mxu1 }
 0x332   :  { %v964_v24 = vmax.f32 %v1241_v21, 0.0 }
 0x334   :  { %v965_v25 = vpack.c.bf16 %v964_v24, %v964_v24 }
 0x336   :  { %1271 = vmatmul.mubr.bf16.vlgmr.msra.gmra.mrb[12].mxu1 %v965_v25 }
 0x409   :  { %v1064_v26 = vpop.f32.mrb[12].mxu1 }
 0x40a   :  { %v1070_v27 = vmax.f32 %v1064_v26, 0.0  ;;  %v1272_v28 = vpop.f32.mrb[13].mxu1 }
 0x40b   :  { %v1067_v29 = vpop.f32.mrb[14].mxu1 }
 0x40c   :  { %v1072_v30 = vsel %vm1071_vm1, %v1070_v27, -inf  ;;  %v1273_v31 = vpop.f32.mrb[15].mxu1 }
 0x40d   :  { %v1073_v32 = vrot.slane %v1072_v30, 4 }
 0x40f   :  { %v1074_v33 = vmax.f32 %v1072_v30, %v1073_v32 }
 0x411   :  { %v1075_v34 = vrot.slane %v1074_v33, 2 }
 0x413   :  { %v1076_v35 = vmax.f32 %v1074_v33, %v1075_v34 }
 0x415   :  { %v1077_v36 = vrot.slane %v1076_v35, 1 }
 0x417   :  { %v1078_v37 = vmax.f32 %v1076_v35, %v1077_v36 }
 0x419   :  { %v1079_v38 = vsub.f32 %v1070_v27, %v1078_v37 }
 0x41b   :  { %v1080_v39 = vmul.f32 1.442695, %v1079_v38 }
 0x41d   :  { %1455 = vpow2.f32 %v1080_v39 }
 0x427   :  { %v1456_v40 = vpop.eup %1455 }
 0x428   :  { %v1082_v41 = vsel %vm1071_vm1, %v1456_v40, 0.0 }
 0x429   :  { %v1083_v42 = vrot.slane %v1082_v41, 4 }
 0x42b   :  { %v1084_v43 = vadd.f32 %v1083_v42, %v1082_v41 }
 0x42d   :  { %v1085_v44 = vrot.slane %v1084_v43, 2 }
 0x42f   :  { %v1086_v45 = vadd.f32 %v1085_v44, %v1084_v43 }
 0x431   :  { %v1087_v46 = vrot.slane %v1086_v45, 1 }
 0x433   :  { %v1088_v47 = vadd.f32 %v1087_v46, %v1086_v45 }
 0x435   :  { %1457 = vrcp.f32 %v1088_v47 }
 0x43f   :  { %v1458_v50 = vpop.eup %1457 }
 0x440   :  { %v1091_v51 = vmul.f32 %v1458_v50, %v1456_v40 }
 0x442   :  { %v1095_v52 = vsel %vm1094_vm2, %v1091_v51, %v1070_v27 }
 0x443   :  { %1096 = vst [vmem:[%s1574_s3] sm:$0x3] %v1095_v52 }
 0x444   :  { %1101 = vsyncpa [#allocation3], 1 }
 0x445   :  { %1102 = vsyncpa [#allocation5], 1 }

</bundles_post_ra>
